<compile_context>
chip_gen: v6e
topology: v6e:2x2x1
jax: 0.10.0
libtpu: 0.0.40
codegen_flags: <defaults>
</compile_context>

<pallas_src>
import jax
import jax.numpy as jnp
from jax.experimental import pallas as pl
from jax.experimental.pallas import tpu as pltpu


def _round_up(x, m):
    return ((x + m - 1) // m) * m


def linear_kernel(x_ref, w_ref, b_ref, o_ref):
    # x_ref: (bt, K)   batch tile
    # w_ref: (K, N)    full weight (pre-transposed)
    # b_ref: (1, N)    bias row
    # o_ref: (bt, N)   output tile (N = 2, full array width)
    acc = jnp.dot(x_ref[...], w_ref[...], preferred_element_type=jnp.float32)
    o_ref[...] = (acc + b_ref[...]).astype(o_ref.dtype)


def linear_pallas(x, w, b, *, block_b=8192):
    """x: (B, K) f32, w: (K, N) f32, b: (1, N) or (N,) f32 -> (B, N) f32."""
    B, K = x.shape
    N = w.shape[1]
    w = w.astype(x.dtype)
    b2 = jnp.reshape(b, (1, N)).astype(x.dtype)

    # Batch tile: multiple of 8 (sublane alignment); keep >= 2 grid steps when B
    # is large (v7x megacore sharding); cap at block_b to bound VMEM.
    bt = max(8, min(block_b, _round_up(pl.cdiv(B, 2), 8)))
    grid = (pl.cdiv(B, bt),)  # ragged last block is masked by Pallas

    # Scoped VMEM: the x tile and the out tile are lane-padded to 128 in VMEM
    # (f32), each double-buffered -> ~2 KiB per row.  Ask for ~2x the need,
    # clamped to [4 MiB, 40 MiB] so v7x (64 MiB/TC) keeps headroom.
    vmem_need = 2 * bt * (128 * 4 + 128 * 4) + 64 * 1024
    vmem_limit = int(min(max(2 * vmem_need, 4 * 1024 * 1024), 40 * 1024 * 1024))

    out = pl.pallas_call(
        linear_kernel,
        out_shape=jax.ShapeDtypeStruct((B, N), x.dtype),
        grid_spec=pltpu.PrefetchScalarGridSpec(
            num_scalar_prefetch=0,
            grid=grid,
            in_specs=[
                pl.BlockSpec((bt, K), lambda i: (i, 0)),  # batch tile of x
                pl.BlockSpec((K, N), lambda i: (0, 0)),   # whole weight
                pl.BlockSpec((1, N), lambda i: (0, 0)),   # whole bias
            ],
            out_specs=pl.BlockSpec((bt, N), lambda i: (i, 0)),
        ),
        compiler_params=pltpu.CompilerParams(
            # Independent batch tiles -> shard grid steps across v7x's 2 TCs.
            dimension_semantics=("parallel",),
            vmem_limit_bytes=vmem_limit,
        ),
        cost_estimate=pl.CostEstimate(
            flops=2 * B * K * N,
            transcendentals=0,
            bytes_accessed=4 * (B * K + K * N + N + B * N),
        ),
    )(x, w, b2)
    return out


def init_params(key, in_features=10, out_features=2):
    # Deterministic init mirroring PyTorch Linear's uniform(-1/sqrt(fan_in), 1/sqrt(fan_in)).
    k_w, k_b = jax.random.split(key)
    bound = 1.0 / jnp.sqrt(jnp.float32(in_features))
    # Stored pre-transposed: (in_features, out_features).
    w = jax.random.uniform(k_w, (in_features, out_features), jnp.float32,
                           minval=-bound, maxval=bound)
    b = jax.random.uniform(k_b, (1, out_features), jnp.float32,
                           minval=-bound, maxval=bound)
    return w, b


if __name__ == "__main__":
    key = jax.random.PRNGKey(0)
    k_x, k_p = jax.random.split(key)

    B, IN, OUT = 8, 10, 2
    x = jax.random.normal(k_x, (B, IN), jnp.float32)
    w, b = init_params(k_p, IN, OUT)

    out = linear_pallas(x, w, b)
    jax.block_until_ready(out)

    # Cross-check against plain JAX reference.
    ref = x @ w + b
    assert out.shape == (B, OUT), out.shape
    assert jnp.allclose(out, ref, atol=1e-5, rtol=1e-5), "mismatch vs reference"

    # Also exercise a ragged batch (B not a multiple of the tile) to validate
    # the masked last block path.
    B2 = 37
    x2 = jax.random.normal(k_x, (B2, IN), jnp.float32)
    out2 = linear_pallas(x2, w, b, block_b=16)
    jax.block_until_ready(out2)
    ref2 = x2 @ w + b
    assert out2.shape == (B2, OUT), out2.shape
    assert jnp.allclose(out2, ref2, atol=1e-5, rtol=1e-5), "ragged mismatch vs reference"

    print("KERNEL_OK")
</pallas_src>

<mosaic_0001>
module attributes {stable_mosaic.version = 11 : i64} {
  func.func @linear_kernel(%arg0: i32, %arg1: memref<8x10xf32, #tpu.memory_space<vmem>>, %arg2: memref<10x2xf32, #tpu.memory_space<vmem>>, %arg3: memref<1x2xf32, #tpu.memory_space<vmem>>, %arg4: memref<8x2xf32, #tpu.memory_space<vmem>>) attributes {dimension_semantics = [#tpu.dimension_semantics<parallel>], iteration_bounds = array<i64: 1>, scalar_prefetch = 0 : i64, scratch_operands = 0 : i64, tpu.core_type = #tpu.core_type<tc>, window_params = [{transform_indices = @transform_0, window_bounds = array<i64: 8, 10>}, {pipeline_mode = #tpu.pipeline_mode<synchronous>, transform_indices = @transform_1, window_bounds = array<i64: 10, 2>}, {pipeline_mode = #tpu.pipeline_mode<synchronous>, transform_indices = @transform_2, window_bounds = array<i64: 1, 2>}, {transform_indices = @transform_3, window_bounds = array<i64: 8, 2>}]} {
    %c0 = arith.constant 0 : index
    %c0_0 = arith.constant 0 : index
    %0 = vector.load %arg1[%c0, %c0_0] : memref<8x10xf32, #tpu.memory_space<vmem>>, vector<8x10xf32>
    %c0_1 = arith.constant 0 : index
    %c0_2 = arith.constant 0 : index
    %1 = vector.load %arg2[%c0_1, %c0_2] : memref<10x2xf32, #tpu.memory_space<vmem>>, vector<10x2xf32>
    %cst = arith.constant dense<0.000000e+00> : vector<8x2xf32>
    %2 = tpu.matmul %0, %1, %cst {dimension_numbers = #tpu.dot_dimension_numbers<[1], [0], [0], [1], [0, 0, 1, 1], [], []>} : vector<8x10xf32>, vector<10x2xf32>, vector<8x2xf32> -> vector<8x2xf32>
    %c0_3 = arith.constant 0 : index
    %c0_4 = arith.constant 0 : index
    %3 = vector.load %arg3[%c0_3, %c0_4] : memref<1x2xf32, #tpu.memory_space<vmem>>, vector<1x2xf32>
    %4 = vector.broadcast %3 : vector<1x2xf32> to vector<8x2xf32>
    %5 = arith.addf %2, %4 : vector<8x2xf32>
    %c0_5 = arith.constant 0 : index
    %c0_6 = arith.constant 0 : index
    %6 = vector.load %arg4[%c0_5, %c0_6] : memref<8x2xf32, #tpu.memory_space<vmem>>, vector<8x2xf32>
    tpu.vector_store %arg4[%c0_5, %c0_6], %5 {strides = array<i32>} : memref<8x2xf32, #tpu.memory_space<vmem>>, vector<8x2xf32>,
    return
  }
  func.func @transform_0(%arg0: i32) -> (i32, i32) {
    %c0_i32 = arith.constant 0 : i32
    %c0_i32_0 = arith.constant 0 : i32
    return %arg0, %c0_i32 : i32, i32
  }
  func.func @transform_1(%arg0: i32) -> (i32, i32) {
    %c0_i32 = arith.constant 0 : i32
    %c0_i32_0 = arith.constant 0 : i32
    %c0_i32_1 = arith.constant 0 : i32
    return %c0_i32, %c0_i32_0 : i32, i32
  }
  func.func @transform_2(%arg0: i32) -> (i32, i32) {
    %c0_i32 = arith.constant 0 : i32
    %c0_i32_0 = arith.constant 0 : i32
    %c0_i32_1 = arith.constant 0 : i32
    return %c0_i32, %c0_i32_0 : i32, i32
  }
  func.func @transform_3(%arg0: i32) -> (i32, i32) {
    %c0_i32 = arith.constant 0 : i32
    %c0_i32_0 = arith.constant 0 : i32
    return %arg0, %c0_i32 : i32, i32
  }
}

</mosaic_0001>

<bundles_post_ra>
// kernel: tpu_custom_call.1
= control target key start
LH: loop header
LB: loop body
LE: loop exit
PB: predicated region body
PF: predicated region fallthrough
CT: control target
= control target key end

     0   :  { %vm28_vm0 = vcmask 1041408   ;;  %v123_v0 = vmov 0.0   ;;  %vm124_vm1 = vmmov 0   ;;  %vm24_vm2 = vcmask 80896   ;;  %s160_s1 = inlined_call_operand.vmem [shape: f32[10,2], index: 1, kind: input, shape index: {}]   ;;  %s161_s0 = inlined_call_operand.vmem [shape: f32[8,10], index: 0, kind: input, shape index: {}]   ;;  %s162_s2 = inlined_call_operand.vmem [shape: f32[1,2], index: 2, kind: input, shape index: {}]   ;;  %s163_s3 = inlined_call_operand.vmem [shape: f32[8,2], index: 3, kind: output, shape index: {}]  }
   0x1   :  { %114 = vmatprep.subr.mxu0 %v123_v0  ;;  %v16_v1 = vld [vmem:[%s160_s1 + $0x8] sm:$0x3]  ;;  %v15_v2 = vld [vmem:[%s160_s1] sm:$0xff]  ;;  %118 = vmatprep.mubr.msk.f32.mxu0 %vm124_vm1, %v123_v0  ;;  %vm102_vm3 = vcmask 15360  }
   0x2   :  { %115 = vmatpush3.msk.msra.mxu0 %vm28_vm0, %v16_v1  ;;  %v14_v3 = vld [vmem:[%s161_s0] sm:$0xff] }
   0x3   :  { %116 = vmatprep.subr.mxu0 %v123_v0  ;;  %v108_v4 = vld [vmem:[%s162_s2] ss:$0 sm:$0xff] }
   0x4   :  { %117 = vmatpush3.msra.mxu0 %v15_v2 }
   0x5   :  { %119 = vmatmul.mubr.msk.f32.vlgmr.msra.gmra.mxu0 %vm24_vm2, %v14_v3 }
  0xc5   :  { %v98_v5 = vpop.f32.mrf.mxu0 }
  0xc6   :  { %v99_v6 = vadd.f32 %v108_v4, %v98_v5 }
  0xc7   :  { %v120_v7 = vpop.f32.mrf.mxu0 }
  0xc8   :  { %103 = vst.msk [vmem:[%s163_s3] sm:$0xff] %vm102_vm3, %v99_v6 }

</bundles_post_ra>
